<compile_context>
chip_gen: v7x
topology: tpu7x:2x2x1
jax: 0.10.0
libtpu: 0.0.40
codegen_flags: <defaults>
</compile_context>

<pallas_src>
import functools
import math

import jax
import jax.numpy as jnp
from jax import lax
from jax.experimental import pallas as pl
from jax.experimental.pallas import tpu as pltpu

_GATE_COUNT = 4
_LANE = 128
_COMPUTE_DTYPE = jnp.bfloat16                 # MXU operand / activation storage dtype
_VMEM_LIMIT_BYTES = 32 * 1024 * 1024          # fits comfortably on v5e/v6e/v7x


# ----------------------------------------------------------------------------
# Small helpers
# ----------------------------------------------------------------------------
def _round_up(x, m):
    return ((x + m - 1) // m) * m


def _largest_divisor(n, cap, multiple):
    """Largest divisor of n that is a multiple of `multiple` and <= cap."""
    cap = min(cap, n)
    cap -= cap % multiple
    for cand in range(cap, multiple - 1, -multiple):
        if n % cand == 0:
            return cand
    return multiple   # n is always a multiple of `multiple` at the call sites


def _pad_blocks(a, axis, n_blocks, blk, blk_pad):
    """Split `a` along `axis` into n_blocks of width blk, zero-pad each to blk_pad."""
    if blk == blk_pad:
        return a
    segs = jnp.split(a, n_blocks, axis=axis)
    pad = [(0, 0)] * a.ndim
    pad[axis] = (0, blk_pad - blk)
    return jnp.concatenate([jnp.pad(s, pad) for s in segs], axis=axis)


def _reorder_gates(a, axis):
    """PyTorch LSTM gate order (i, f, g, o) -> kernel order (i, f, o, g)."""
    i, f, g, o = jnp.split(a, 4, axis=axis)
    return jnp.concatenate([i, f, o, g], axis=axis)


# ----------------------------------------------------------------------------
# Kernel 1: M/N-tiled split-K GEMM + bias (+ optional sigmoid, row zero-mask).
# Used for (a) the hoisted input projection of every LSTM layer (one or two
# feature halves) and (b) fc_mi.
# ----------------------------------------------------------------------------
def _matmul_bias_kernel(*refs, n_pairs, apply_sigmoid, valid_rows, tile_m):
    xs = refs[:n_pairs]
    ws = refs[n_pairs:2 * n_pairs]
    b_ref = refs[2 * n_pairs]
    o_ref = refs[2 * n_pairs + 1]

    acc = jnp.dot(xs[0][...], ws[0][...], preferred_element_type=jnp.float32)
    for p in range(1, n_pairs):
        acc = acc + jnp.dot(xs[p][...], ws[p][...],
                            preferred_element_type=jnp.float32)
    y = acc + b_ref[...]
    if apply_sigmoid:
        y = jax.nn.sigmoid(y)
    if valid_rows is not None:
        # zero out rows belonging to padded time steps so the (time-reversed)
        # backward recurrence starts from a clean zero state.
        row = pl.program_id(0) * tile_m + lax.broadcasted_iota(jnp.int32, y.shape, 0)
        y = jnp.where(row < valid_rows, y, 0.0)
    o_ref[...] = y.astype(o_ref.dtype)


def _matmul_bias(xs, ws, b, *, out_dtype, apply_sigmoid=False, valid_rows=None,
                 tile_m=512, tile_n=1024):
    m = xs[0].shape[0]
    n = ws[0].shape[1]
    tm = _largest_divisor(m, tile_m, 8)
    tn = _largest_divisor(n, tile_n, _LANE)
    n_pairs = len(xs)

    kernel = functools.partial(_matmul_bias_kernel, n_pairs=n_pairs,
                               apply_sigmoid=apply_sigmoid,
                               valid_rows=valid_rows, tile_m=tm)
    in_specs = (
        [pl.BlockSpec((tm, x.shape[1]), lambda i, j: (i, 0)) for x in xs]
        + [pl.BlockSpec((w.shape[0], tn), lambda i, j: (0, j)) for w in ws]
        + [pl.BlockSpec((1, tn), lambda i, j: (0, j))]          # bias
    )
    return pl.pallas_call(
        kernel,
        out_shape=jax.ShapeDtypeStruct((m, n), out_dtype),
        grid=(m // tm, n // tn),
        in_specs=in_specs,
        out_specs=pl.BlockSpec((tm, tn), lambda i, j: (i, j)),
        compiler_params=pltpu.CompilerParams(
            dimension_semantics=("parallel", "parallel"),
            vmem_limit_bytes=_VMEM_LIMIT_BYTES),
    )(*xs, *ws, b)


# ----------------------------------------------------------------------------
# Kernel 2: fused bidirectional LSTM recurrence over one time-chunk.
#   grid = (time_chunk,); gates_x already holds X @ W_ih^T + b for both dirs.
#   Forward walks chunks 0..nc-1, backward walks nc-1..0 — both in one body so
#   the two independent dependency chains interleave on one TensorCore.
# ----------------------------------------------------------------------------
def _bilstm_chunk_kernel(gxf_ref, gxb_ref, whf_ref, whb_ref, of_ref, ob_ref,
                         hf_ref, cf_ref, hb_ref, cb_ref, *, hp, tt):
    @pl.when(pl.program_id(0) == 0)
    def _():
        hf_ref[...] = jnp.zeros_like(hf_ref)
        cf_ref[...] = jnp.zeros_like(cf_ref)
        hb_ref[...] = jnp.zeros_like(hb_ref)
        cb_ref[...] = jnp.zeros_like(cb_ref)

    whf = whf_ref[...]
    whb = whb_ref[...]

    def gate_math(gates, c):
        # gates layout per direction: [i | f | o | g], each a lane-aligned hp stripe.
        sig = 0.5 * jnp.tanh(0.5 * gates[:, :3 * hp]) + 0.5   # one EUP pass / elem
        i_g = sig[:, 0 * hp:1 * hp]
        f_g = sig[:, 1 * hp:2 * hp]
        o_g = sig[:, 2 * hp:3 * hp]
        g_g = jnp.tanh(gates[:, 3 * hp:4 * hp])
        c_new = f_g * c + i_g * g_g
        h_new = o_g * jnp.tanh(c_new)
        return h_new, c_new

    def step(i, carry):
        hf, cf, hb, cb = carry
        tb = tt - 1 - i                     # backward walks its chunk in reverse
        gf = gxf_ref[i].astype(jnp.float32) + jnp.dot(
            hf.astype(jnp.bfloat16), whf, preferred_element_type=jnp.float32)
        gb = gxb_ref[tb].astype(jnp.float32) + jnp.dot(
            hb.astype(jnp.bfloat16), whb, preferred_element_type=jnp.float32)
        hf, cf = gate_math(gf, cf)
        hb, cb = gate_math(gb, cb)
        of_ref[i] = hf.astype(of_ref.dtype)
        ob_ref[tb] = hb.astype(ob_ref.dtype)
        return hf, cf, hb, cb

    hf, cf, hb, cb = lax.fori_loop(
        0, tt, step, (hf_ref[...], cf_ref[...], hb_ref[...], cb_ref[...]),
        unroll=min(8, tt))
    hf_ref[...] = hf
    cf_ref[...] = cf
    hb_ref[...] = hb
    cb_ref[...] = cb


def _bilstm_layer(gates_x, whh_f, whh_b, *, hidden_pad, batch, chunk):
    t_pad = gates_x.shape[0]
    hp = hidden_pad
    nc = t_pad // chunk
    kernel = functools.partial(_bilstm_chunk_kernel, hp=hp, tt=chunk)
    out_sd = jax.ShapeDtypeStruct((t_pad, batch, hp), _COMPUTE_DTYPE)
    return pl.pallas_call(
        kernel,
        out_shape=(out_sd, out_sd),
        grid=(nc,),
        in_specs=[
            # forward gates: chunk c, column-block 0 (first 4*hp lanes)
            pl.BlockSpec((chunk, batch, _GATE_COUNT * hp), lambda c: (c, 0, 0)),
            # backward gates: chunk nc-1-c, column-block 1 (last 4*hp lanes)
            pl.BlockSpec((chunk, batch, _GATE_COUNT * hp),
                         lambda c: (nc - 1 - c, 0, 1)),
            pl.BlockSpec((hp, _GATE_COUNT * hp), lambda c: (0, 0)),   # W_hh fwd
            pl.BlockSpec((hp, _GATE_COUNT * hp), lambda c: (0, 0)),   # W_hh bwd
        ],
        out_specs=(
            pl.BlockSpec((chunk, batch, hp), lambda c: (c, 0, 0)),
            pl.BlockSpec((chunk, batch, hp), lambda c: (nc - 1 - c, 0, 0)),
        ),
        scratch_shapes=[pltpu.VMEM((batch, hp), jnp.float32),   # h fwd
                        pltpu.VMEM((batch, hp), jnp.float32),   # c fwd
                        pltpu.VMEM((batch, hp), jnp.float32),   # h bwd
                        pltpu.VMEM((batch, hp), jnp.float32)],  # c bwd
        compiler_params=pltpu.CompilerParams(
            dimension_semantics=("arbitrary",),
            vmem_limit_bytes=_VMEM_LIMIT_BYTES),
    )(gates_x, gates_x, whh_f, whh_b)


# ----------------------------------------------------------------------------
# Weight preparation: PyTorch-layout params -> padded / reordered / bf16 params.
# Hidden size padded to a multiple of 128 per gate / per direction; padded
# columns carry zero weights+bias so padded h/c lanes stay exactly zero.
# ----------------------------------------------------------------------------
def prepare_padded_params(params):
    H = int(params["lstm"][0][0]["w_hh"].shape[1])
    Hp = _round_up(H, _LANE)
    layers = []
    for li, dirs in enumerate(params["lstm"]):
        w_proj_parts, b_parts, whh_dirs = [], [], []
        for p in dirs:
            w_ih = _reorder_gates(p["w_ih"], 0)
            w_hh = _reorder_gates(p["w_hh"], 0)
            bias = _reorder_gates(p["b_ih"] + p["b_hh"], 0)
            w_ih = _pad_blocks(w_ih, 0, _GATE_COUNT, H, Hp)
            w_hh = _pad_blocks(w_hh, 0, _GATE_COUNT, H, Hp)
            bias = _pad_blocks(bias, 0, _GATE_COUNT, H, Hp)
            if li > 0:     # layers > 0 consume the previous layer's 2*Hp features
                w_ih = _pad_blocks(w_ih, 1, 2, H, Hp)
            w_hh = _pad_blocks(w_hh, 1, 1, H, Hp)
            w_proj_parts.append(w_ih.T)                            # (d_in_pad, 4*Hp)
            whh_dirs.append(w_hh.T.astype(_COMPUTE_DTYPE))         # (Hp, 4*Hp)
            b_parts.append(bias)
        w_proj_cat = jnp.concatenate(w_proj_parts, axis=1)         # (d_in_pad, 8*Hp)
        if li == 0:
            w_proj = (w_proj_cat.astype(_COMPUTE_DTYPE),)
        else:
            # split K: rows 0:Hp multiply the forward features, Hp:2Hp the backward
            w_proj = (w_proj_cat[:Hp].astype(_COMPUTE_DTYPE),
                      w_proj_cat[Hp:].astype(_COMPUTE_DTYPE))
        layers.append({
            "w_proj": w_proj,
            "b_proj": jnp.concatenate(b_parts)[None, :].astype(jnp.float32),
            "whh_f": whh_dirs[0],
            "whh_b": whh_dirs[1],
        })
    O = int(params["fc_w"].shape[0])
    Op = _round_up(O, _LANE)
    fc_w = _pad_blocks(params["fc_w"], 1, 2, H, Hp)                # (O, 2*Hp)
    fc_w = _pad_blocks(fc_w, 0, 1, O, Op)                          # (Op, 2*Hp)
    fc_w_t = fc_w.T                                                # (2*Hp, Op)
    fc_b = _pad_blocks(params["fc_b"], 0, 1, O, Op)                # (Op,)
    return {
        "layers": layers,
        "fc_w": (fc_w_t[:Hp].astype(_COMPUTE_DTYPE), fc_w_t[Hp:].astype(_COMPUTE_DTYPE)),
        "fc_b": fc_b[None, :].astype(jnp.float32),
        "hidden_pad": Hp,
        "out_pad": Op,
    }


# ----------------------------------------------------------------------------
# Forward pass (mirrors uPIT_LSTM.forward, inference semantics)
# ----------------------------------------------------------------------------
def upit_lstm_forward(inputs, params, *, output_dim, num_speaker=2, time_chunk=64):
    pp = prepare_padded_params(params)
    Hp, Op = pp["hidden_pad"], pp["out_pad"]

    x = inputs[0].astype(jnp.float32)          # (B, T, D), batch_first
    B, T, D = x.shape
    Bp = _round_up(B, 8)                       # full-sublane batch

    TT = max(1, min(time_chunk, T))            # LSTM steps per grid iteration
    T_pad = _round_up(T, TT)

    # One transpose of the small network input to time-major; everything after
    # that stays time-major (no per-layer transpose / concatenate passes).
    x_tm = jnp.transpose(x, (1, 0, 2))
    x_tm = jnp.pad(x_tm, ((0, T_pad - T), (0, Bp - B), (0, 0)))

    rows = T_pad * Bp
    valid_rows = T * Bp if T_pad != T else None

    feats = (x_tm.reshape(rows, D).astype(_COMPUTE_DTYPE),)
    for lp in pp["layers"]:
        # hoisted input projection: all time steps, both directions, bias folded in
        gates_x = _matmul_bias(feats, lp["w_proj"], lp["b_proj"],
                               out_dtype=_COMPUTE_DTYPE, valid_rows=valid_rows)
        gates_x = gates_x.reshape(T_pad, Bp, 2 * _GATE_COUNT * Hp)
        out_f, out_b = _bilstm_layer(gates_x, lp["whh_f"], lp["whh_b"],
                                     hidden_pad=Hp, batch=Bp, chunk=TT)
        feats = (out_f.reshape(rows, Hp), out_b.reshape(rows, Hp))
        # TODO(synk): nn.LSTM inter-layer dropout is train-mode-only/stochastic;
        # inference semantics (dropout disabled) are implemented here.

    # fc_mi + sigmoid on the flattened time-major slab, lane-dense padded output
    masks_flat = _matmul_bias(feats, pp["fc_w"], pp["fc_b"],
                              out_dtype=jnp.float32, apply_sigmoid=True)
    n_out = output_dim * num_speaker
    masks = masks_flat.reshape(T_pad, Bp, Op)[:T, :B, :n_out]
    masks = jnp.transpose(masks, (1, 0, 2)).reshape(B, T, output_dim, num_speaker)
    return [masks[..., 0], masks[..., 1]]


# ----------------------------------------------------------------------------
# Deterministic parameter init (PyTorch default uniform(-1/sqrt(H), +1/sqrt(H)))
# ----------------------------------------------------------------------------
def init_params(key, input_dim, output_dim, hidden_dim, num_layers, num_speaker):
    k = 1.0 / math.sqrt(hidden_dim)
    lstm = []
    for layer in range(num_layers):
        d_in = input_dim if layer == 0 else 2 * hidden_dim
        dirs = []
        for _ in range(2):  # forward, backward
            key, k1, k2, k3, k4 = jax.random.split(key, 5)
            dirs.append({
                "w_ih": jax.random.uniform(k1, (4 * hidden_dim, d_in), jnp.float32, -k, k),
                "w_hh": jax.random.uniform(k2, (4 * hidden_dim, hidden_dim), jnp.float32, -k, k),
                "b_ih": jax.random.uniform(k3, (4 * hidden_dim,), jnp.float32, -k, k),
                "b_hh": jax.random.uniform(k4, (4 * hidden_dim,), jnp.float32, -k, k),
            })
        lstm.append(dirs)
    key, kw, kb = jax.random.split(key, 3)
    kf = 1.0 / math.sqrt(2 * hidden_dim)
    fc_w = jax.random.uniform(kw, (output_dim * num_speaker, 2 * hidden_dim),
                              jnp.float32, -kf, kf)
    fc_b = jax.random.uniform(kb, (output_dim * num_speaker,), jnp.float32, -kf, kf)
    return {"lstm": lstm, "fc_w": fc_w, "fc_b": fc_b}


# ----------------------------------------------------------------------------
# Pure-JAX f32 reference (correctness check only)
# ----------------------------------------------------------------------------
def _ref_direction(x_tm, w_ih, w_hh, b_ih, b_hh, reverse):
    H = w_hh.shape[1]
    B = x_tm.shape[1]
    xs = x_tm[::-1] if reverse else x_tm

    def step(carry, x_t):
        h, c = carry
        gates = x_t @ w_ih.T + h @ w_hh.T + b_ih + b_hh
        i = jax.nn.sigmoid(gates[:, :H])
        f = jax.nn.sigmoid(gates[:, H:2 * H])
        g = jnp.tanh(gates[:, 2 * H:3 * H])
        o = jax.nn.sigmoid(gates[:, 3 * H:])
        c = f * c + i * g
        h = o * jnp.tanh(c)
        return (h, c), h

    init = (jnp.zeros((B, H), jnp.float32), jnp.zeros((B, H), jnp.float32))
    _, ys = lax.scan(step, init, xs)
    return ys[::-1] if reverse else ys


def reference_forward(inputs, params, *, output_dim, num_speaker=2):
    x = inputs[0].astype(jnp.float32)
    B, T, _ = x.shape
    layer_in = jnp.transpose(x, (1, 0, 2))
    for dirs in params["lstm"]:
        outs = []
        for d, reverse in enumerate((False, True)):
            p = dirs[d]
            outs.append(_ref_direction(layer_in, p["w_ih"], p["w_hh"],
                                       p["b_ih"], p["b_hh"], reverse))
        layer_in = jnp.concatenate(outs, axis=-1)
    rnn_out = jnp.transpose(layer_in, (1, 0, 2))
    masks = jax.nn.sigmoid(rnn_out @ params["fc_w"].T + params["fc_b"])
    masks = masks.reshape(B, T, output_dim, num_speaker)
    return [masks[..., 0], masks[..., 1]]


# ----------------------------------------------------------------------------
if __name__ == "__main__":
    B, T = 2, 8
    input_dim, output_dim = 16, 16
    hidden_dim, num_layers, num_speaker = 32, 3, 2

    key = jax.random.PRNGKey(0)
    kx, kp = jax.random.split(key)
    x = jax.random.normal(kx, (B, T, input_dim), jnp.float32)
    params = init_params(kp, input_dim, output_dim, hidden_dim, num_layers,
                         num_speaker)

    masks = upit_lstm_forward([x], params, output_dim=output_dim,
                              num_speaker=num_speaker)
    for m in masks:
        jax.block_until_ready(m)

    ref = reference_forward([x], params, output_dim=output_dim,
                            num_speaker=num_speaker)
    for got, want in zip(masks, ref):
        assert got.shape == (B, T, output_dim), got.shape
        err = float(jnp.max(jnp.abs(got - want)))
        # bf16 MXU operands / bf16 activation storage vs f32 reference
        assert err < 5e-2, err

    print("KERNEL_OK")
</pallas_src>

<mosaic_0001>
module attributes {stable_mosaic.version = 11 : i64} {
  func.func @_matmul_bias_kernel(%arg0: i32, %arg1: i32, %arg2: memref<64x16xbf16, #tpu.memory_space<vmem>>, %arg3: memref<16x1024xbf16, #tpu.memory_space<vmem>>, %arg4: memref<1x1024xf32, #tpu.memory_space<vmem>>, %arg5: memref<64x1024xbf16, #tpu.memory_space<vmem>>) attributes {dimension_semantics = [#tpu.dimension_semantics<parallel>, #tpu.dimension_semantics<parallel>], iteration_bounds = array<i64: 1, 1>, scalar_prefetch = 0 : i64, scratch_operands = 0 : i64, tpu.core_type = #tpu.core_type<tc>, window_params = [{transform_indices = @transform_0, window_bounds = array<i64: 64, 16>}, {transform_indices = @transform_1, window_bounds = array<i64: 16, 1024>}, {transform_indices = @transform_2, window_bounds = array<i64: 1, 1024>}, {transform_indices = @transform_3, window_bounds = array<i64: 64, 1024>}]} {
    %c0 = arith.constant 0 : index
    %c0_0 = arith.constant 0 : index
    %0 = vector.load %arg2[%c0, %c0_0] : memref<64x16xbf16, #tpu.memory_space<vmem>>, vector<64x16xbf16>
    %c0_1 = arith.constant 0 : index
    %c0_2 = arith.constant 0 : index
    %1 = vector.load %arg3[%c0_1, %c0_2] : memref<16x1024xbf16, #tpu.memory_space<vmem>>, vector<16x1024xbf16>
    %cst = arith.constant dense<0.000000e+00> : vector<64x1024xf32>
    %2 = tpu.matmul %0, %1, %cst {dimension_numbers = #tpu.dot_dimension_numbers<[1], [0], [0], [1], [0, 0, 1, 1], [], []>} : vector<64x16xbf16>, vector<16x1024xbf16>, vector<64x1024xf32> -> vector<64x1024xf32>
    %c0_3 = arith.constant 0 : index
    %c0_4 = arith.constant 0 : index
    %3 = vector.load %arg4[%c0_3, %c0_4] : memref<1x1024xf32, #tpu.memory_space<vmem>>, vector<1x1024xf32>
    %4 = vector.broadcast %3 : vector<1x1024xf32> to vector<64x1024xf32>
    %5 = arith.addf %2, %4 : vector<64x1024xf32>
    %6 = arith.truncf %5 : vector<64x1024xf32> to vector<64x1024xbf16>
    %c0_5 = arith.constant 0 : index
    %c0_6 = arith.constant 0 : index
    %7 = vector.load %arg5[%c0_5, %c0_6] : memref<64x1024xbf16, #tpu.memory_space<vmem>>, vector<64x1024xbf16>
    tpu.vector_store %arg5[%c0_5, %c0_6], %6 {strides = array<i32>} : memref<64x1024xbf16, #tpu.memory_space<vmem>>, vector<64x1024xbf16>,
    return
  }
  func.func @transform_0(%arg0: i32, %arg1: i32) -> (i32, i32) {
    %c0_i32 = arith.constant 0 : i32
    %c0_i32_0 = arith.constant 0 : i32
    return %arg0, %c0_i32 : i32, i32
  }
  func.func @transform_1(%arg0: i32, %arg1: i32) -> (i32, i32) {
    %c0_i32 = arith.constant 0 : i32
    %c0_i32_0 = arith.constant 0 : i32
    return %c0_i32, %arg1 : i32, i32
  }
  func.func @transform_2(%arg0: i32, %arg1: i32) -> (i32, i32) {
    %c0_i32 = arith.constant 0 : i32
    %c0_i32_0 = arith.constant 0 : i32
    return %c0_i32, %arg1 : i32, i32
  }
  func.func @transform_3(%arg0: i32, %arg1: i32) -> (i32, i32) {
    %c0_i32 = arith.constant 0 : i32
    return %arg0, %arg1 : i32, i32
  }
}

</mosaic_0001>

<bundles_post_ra>
// kernel: tpu_custom_call.1
= control target key start
LH: loop header
LB: loop body
LE: loop exit
PB: predicated region body
PF: predicated region fallthrough
CT: control target
= control target key end

     0   :  { %8 = vsyncpa [#allocation3], 0  ;;  %s1029_s0 = inlined_call_operand.vmem [shape: bf16[64,16], index: 0, kind: input, shape index: {}]   ;;  %s1030_s1 = inlined_call_operand.hbm [shape: bf16[16,1024], index: 1, kind: input, shape index: {}]   ;;  %s1031_s2 = inlined_call_operand.vmem [shape: f32[1,1024], index: 2, kind: input, shape index: {}]   ;;  %s1032_s3 = inlined_call_operand.hbm [shape: bf16[64,1024], index: 3, kind: output, shape index: {}]  }
   0x1   :  { %9 = vsyncpa [#allocation4], 0  ;;  %s843_s12 = smov [#allocation2]   ;;  %s795_s16 = scalar_lea.hbm %s1030_s1, 1024 }
   0x2   :  { %s17_s13 = sshll.u32 %s843_s12, 4  ;;  %p796_p0 = scmp.ne.s32.totalorder %s1030_s1, %s795_s16  ;;  %s18_s13 = int_to_ptr.vmem [resolvable:$true] %s17_s13 }
   0x3   :  { %p799_p1 = scmp.lt.u32.totalorder %s795_s16, %s1030_s1 }
   0x5   :  { %p801_p2 = pnand %p799_p1, %p796_p0 }
   0x7   :  { %804 = shalt.err (!%p801_p2)
}
   0x8   :  { %s805_s21 = scalar_lea.vmem %s18_s13, 1024  ;;  %p810_p4 = scmp.lt.s32.totalorder %s18_s13, %s18_s13 }
   0x9   :  { %p806_p3 = scmp.ne.s32.totalorder %s18_s13, %s805_s21  ;;  %p811_p5 = scmp.lt.s32.totalorder %s805_s21, %s805_s21 }
   0xb   :  { %p812_p6 = por %p811_p5, %p810_p4 }
   0xd   :  { %p813_p7 = pnand %p812_p6, %p806_p3 }
   0xf   :  { %816 = shalt.err (!%p813_p7)
}
  0x10   :  { %s844_s22 = smov 512   ;;  %s845_s23 = smov 32  }
  0x11   :  { %23 = dma.hbm_to_vmem [thread:$0]  %s1030_s1, 1024, %s18_s13, [#allocation3], %s844_s22, %s844_s22, %s845_s23  }
  0x12   :  { %839 = dma.done.wait [#allocation3], 1024  }
  0x13   :  { %840 = vsyncadd [#allocation3], 4294966272  ;;  %v846_v0 = vmov 0   ;;  %v38_v1 = vld [vmem:[#allocation2] sm:$0xff]  ;;  %v39_v3 = vld [vmem:[#allocation2 + $0x8] sm:$0xff]  ;;  %vm148_vm0 = vcmask 130048   ;;  %v48_v21 = vlaneseq }
  0x14   :  { %193 = vmatprep.mubr.bf16.mxu0 %v846_v0  ;;  %266 = vmatprep.mubr.bf16.mxu1 %v846_v0  ;;  %v42_v2 = vld [vmem:[#allocation2 + $0x20] sm:$0xff]  ;;  %v43_v5 = vld [vmem:[#allocation2 + $0x28] sm:$0xff]  ;;  %v40_v10 = vld [vmem:[#allocation2 + $0x10] sm:$0xff] }
  0x15   :  { %v699_v4 = vcombine.high %v38_v1, %v42_v2  ;;  %v698_v6 = vcombine.low %v38_v1, %v42_v2  ;;  %v701_v7 = vcombine.high %v39_v3, %v43_v5  ;;  %v700_v8 = vcombine.low %v39_v3, %v43_v5  ;;  %v791_v9 = vld [vmem:[%s1029_s0] sm:$0xff]   ;;  %v44_v11 = vld [vmem:[#allocation2 + $0x30] sm:$0xff]  ;;  %v41_v13 = vld [vmem:[#allocation2 + $0x18] sm:$0xff] }
  0x16   :  { %v703_v12 = vcombine.high %v40_v10, %v44_v11  ;;  %v45_v14 = vld [vmem:[#allocation2 + $0x38] sm:$0xff]  ;;  %v702_v15 = vcombine.low %v40_v10, %v44_v11  ;;  %v792_v18 = vld [vmem:[%s1029_s0 + $0x8] sm:$0xff]   ;;  %v793_v19 = vld [vmem:[%s1029_s0 + $0x10] sm:$0xff]   ;;  %v911_v22 = vshrl.u32 %v48_v21, 7 }
  0x17   :  { %161 = vmatprep.subr.bf16.mxu0 %v699_v4  ;;  %234 = vmatprep.subr.bf16.mxu1 %v701_v7  ;;  %v705_v16 = vcombine.high %v41_v13, %v45_v14  ;;  %v704_v17 = vcombine.low %v41_v13, %v45_v14  ;;  %v794_v20 = vld [vmem:[%s1029_s0 + $0x18] sm:$0xff]   ;;  %v917_v24 = vld [vmem:[%s1031_s2] sm:$0xff]  ;;  %s847_s2 = smov [#allocation5]  }
  0x18   :  { %162 = vmatpush1.bf16.msra.mxu0 %v698_v6  ;;  %235 = vmatpush1.bf16.msra.mxu1 %v700_v8  ;;  %v50_v23 = vsub.s32 0, %v911_v22  ;;  %v58_v25 = vsub.s32 2, %v911_v22  ;;  %v54_v26 = vsub.s32 1, %v911_v22  ;;  %v62_v27 = vsub.s32 3, %v911_v22  ;;  %s682_s7 = sshll.u32 %s847_s2, 4  ;;  %s683_s7 = int_to_ptr.vmem [resolvable:$true] %s682_s7 }
  0x19   :  { %307 = vmatprep.subr.bf16.mxu0 %v703_v12  ;;  %380 = vmatprep.subr.bf16.mxu1 %v705_v16  ;;  %s817_s8 = scalar_lea.vmem %s683_s7, 4096  ;;  %p822_p9 = scmp.lt.s32.totalorder %s683_s7, %s683_s7 }
  0x1a   :  { %v923_v28 = vrot.slane %v917_v24, %v50_v23  ;;  %v926_v29 = vrot.slane %v917_v24, %v58_v25  ;;  %v929_v30 = vrot.slane %v917_v24, %v54_v26  ;;  %v932_v31 = vrot.slane %v917_v24, %v62_v27  ;;  %p818_p8 = scmp.ne.s32.totalorder %s683_s7, %s817_s8  ;;  %p823_p10 = scmp.lt.s32.totalorder %s817_s8, %s817_s8 }
  0x1b   :  { %706 = vmatmul.mubr.msk.bf16.vlgmr.msra.gmra.mrb[0].mxu0 %vm148_vm0, %v791_v9  ;;  %710 = vmatmul.mubr.msk.bf16.vlgmr.msra.gmra.mrb[0].mxu1 %vm148_vm0, %v791_v9 }
  0x1c   :  { %308 = vmatpush1.bf16.msra.mxu0 %v702_v15  ;;  %381 = vmatpush1.bf16.msra.mxu1 %v704_v17  ;;  %p824_p11 = por %p823_p10, %p822_p9 }
  0x1d   :  { %203 = vmatprep.mubr.bf16.mxu0 %v846_v0  ;;  %276 = vmatprep.mubr.bf16.mxu1 %v846_v0 }
  0x1e   :  { %p825_p12 = pnand %p824_p11, %p818_p8 }
  0x23   :  { %707 = vmatmul.mubr.msk.bf16.gmra.mrb[4].mxu0 %vm148_vm0, %v792_v18  ;;  %711 = vmatmul.mubr.msk.bf16.gmra.mrb[4].mxu1 %vm148_vm0, %v792_v18 }
  0x24   :  { %213 = vmatprep.mubr.bf16.mxu0 %v846_v0  ;;  %286 = vmatprep.mubr.bf16.mxu1 %v846_v0 }
  0x2b   :  { %708 = vmatmul.mubr.msk.bf16.gmra.mrb[8].mxu0 %vm148_vm0, %v793_v19  ;;  %712 = vmatmul.mubr.msk.bf16.gmra.mrb[8].mxu1 %vm148_vm0, %v793_v19 }
  0x2c   :  { %223 = vmatprep.mubr.bf16.mxu0 %v846_v0  ;;  %296 = vmatprep.mubr.bf16.mxu1 %v846_v0 }
  0x33   :  { %709 = vmatmul.mubr.msk.bf16.gmra.mrb[12].mxu0 %vm148_vm0, %v794_v20  ;;  %713 = vmatmul.mubr.msk.bf16.gmra.mrb[12].mxu1 %vm148_vm0, %v794_v20 }
  0x34   :  { %339 = vmatprep.mubr.bf16.mxu0 %v846_v0  ;;  %412 = vmatprep.mubr.bf16.mxu1 %v846_v0 }
  0x3b   :  { %714 = vmatmul.mubr.msk.bf16.vlgmr.msra.gmra.mrb[16].mxu0 %vm148_vm0, %v791_v9  ;;  %718 = vmatmul.mubr.msk.bf16.vlgmr.msra.gmra.mrb[16].mxu1 %vm148_vm0, %v791_v9 }
  0x3c   :  { %349 = vmatprep.mubr.bf16.mxu0 %v846_v0  ;;  %422 = vmatprep.mubr.bf16.mxu1 %v846_v0 }
  0x43   :  { %715 = vmatmul.mubr.msk.bf16.gmra.mrb[20].mxu0 %vm148_vm0, %v792_v18  ;;  %719 = vmatmul.mubr.msk.bf16.gmra.mrb[20].mxu1 %vm148_vm0, %v792_v18 }
  0x44   :  { %359 = vmatprep.mubr.bf16.mxu0 %v846_v0  ;;  %432 = vmatprep.mubr.bf16.mxu1 %v846_v0 }
  0x4b   :  { %716 = vmatmul.mubr.msk.bf16.gmra.mrb[24].mxu0 %vm148_vm0, %v793_v19  ;;  %720 = vmatmul.mubr.msk.bf16.gmra.mrb[24].mxu1 %vm148_vm0, %v793_v19 }
  0x4c   :  { %369 = vmatprep.mubr.bf16.mxu0 %v846_v0  ;;  %442 = vmatprep.mubr.bf16.mxu1 %v846_v0 }
  0x53   :  { %717 = vmatmul.mubr.msk.bf16.gmra.mrb[28].mxu0 %vm148_vm0, %v794_v20  ;;  %721 = vmatmul.mubr.msk.bf16.gmra.mrb[28].mxu1 %vm148_vm0, %v794_v20 }
  0xee   :  { %v195_v32 = vpop.f32.mrb[0].mxu0  ;;  %v268_v34 = vpop.f32.mrb[0].mxu1 }
  0xef   :  { %v196_v33 = vadd.f32 %v195_v32, %v923_v28  ;;  %v197_v35 = vpop.f32.mrb[1].mxu0  ;;  %v269_v36 = vadd.f32 %v268_v34, %v926_v29  ;;  %v270_v38 = vpop.f32.mrb[1].mxu1 }
  0xf0   :  { %v198_v37 = vadd.f32 %v197_v35, %v929_v30  ;;  %v199_v39 = vpop.f32.mrb[2].mxu0  ;;  %v271_v40 = vadd.f32 %v270_v38, %v932_v31  ;;  %v272_v42 = vpop.f32.mrb[2].mxu1  ;;  %v66_v38 = vsub.s32 4, %v911_v22 }
  0xf1   :  { %v200_v41 = vadd.f32 %v199_v39, %v923_v28  ;;  %v201_v43 = vpop.f32.mrb[3].mxu0  ;;  %v273_v45 = vadd.f32 %v272_v42, %v926_v29  ;;  %v274_v47 = vpop.f32.mrb[3].mxu1 }
  0xf2   :  { %v754_v44 = vpack.c.bf16 %v198_v37, %v196_v33  ;;  %v202_v46 = vadd.f32 %v201_v43, %v929_v30  ;;  %v755_v48 = vpack.c.bf16 %v271_v40, %v269_v36  ;;  %v275_v49 = vadd.f32 %v274_v47, %v932_v31 }
  0xf3   :  { %v74_v43 = vsub.s32 6, %v911_v22 }
  0xf4   :  { %645 = vst [vmem:[#allocation5] sm:$0xff] %v754_v44  ;;  %v758_v50 = vpack.c.bf16 %v202_v46, %v200_v41  ;;  %646 = vst [vmem:[#allocation5 + $0x8] sm:$0xff] %v755_v48  ;;  %v759_v51 = vpack.c.bf16 %v275_v49, %v273_v45  ;;  %v70_v44 = vsub.s32 5, %v911_v22  ;;  %v78_v49 = vsub.s32 7, %v911_v22 }
  0xf6   :  { %649 = vst [vmem:[#allocation5 + $0x20] sm:$0xff] %v758_v50  ;;  %v205_v52 = vpop.f32.mrb[4].mxu0  ;;  %650 = vst [vmem:[#allocation5 + $0x28] sm:$0xff] %v759_v51  ;;  %v278_v54 = vpop.f32.mrb[4].mxu1 }
  0xf7   :  { %v206_v53 = vadd.f32 %v205_v52, %v923_v28  ;;  %v207_v55 = vpop.f32.mrb[5].mxu0  ;;  %v279_v56 = vadd.f32 %v278_v54, %v926_v29  ;;  %v280_v58 = vpop.f32.mrb[5].mxu1 }
  0xf8   :  { %v208_v57 = vadd.f32 %v207_v55, %v929_v30  ;;  %v209_v59 = vpop.f32.mrb[6].mxu0  ;;  %v281_v60 = vadd.f32 %v280_v58, %v932_v31  ;;  %v282_v62 = vpop.f32.mrb[6].mxu1  ;;  %v977_v58 = vrot.slane %v917_v24, %v70_v44 }
  0xf9   :  { %v210_v61 = vadd.f32 %v209_v59, %v923_v28  ;;  %v211_v63 = vpop.f32.mrb[7].mxu0  ;;  %v283_v1 = vadd.f32 %v282_v62, %v926_v29  ;;  %v284_v3 = vpop.f32.mrb[7].mxu1 }
  0xfa   :  { %v762_v0 = vpack.c.bf16 %v208_v57, %v206_v53  ;;  %v212_v2 = vadd.f32 %v211_v63, %v929_v30  ;;  %v763_v4 = vpack.c.bf16 %v281_v60, %v279_v56  ;;  %v285_v5 = vadd.f32 %v284_v3, %v932_v31 }
  0xfb   :  { %v971_v56 = vrot.slane %v917_v24, %v66_v38 }
  0xfc   :  { %653 = vst [vmem:[#allocation5 + $0x40] sm:$0xff] %v762_v0  ;;  %v766_v6 = vpack.c.bf16 %v212_v2, %v210_v61  ;;  %654 = vst [vmem:[#allocation5 + $0x48] sm:$0xff] %v763_v4  ;;  %v767_v7 = vpack.c.bf16 %v285_v5, %v283_v1 }
  0xfe   :  { %657 = vst [vmem:[#allocation5 + $0x60] sm:$0xff] %v766_v6  ;;  %v215_v8 = vpop.f32.mrb[8].mxu0  ;;  %658 = vst [vmem:[#allocation5 + $0x68] sm:$0xff] %v767_v7  ;;  %v288_v10 = vpop.f32.mrb[8].mxu1 }
  0xff   :  { %v216_v9 = vadd.f32 %v215_v8, %v923_v28  ;;  %v217_v11 = vpop.f32.mrb[9].mxu0  ;;  %v289_v12 = vadd.f32 %v288_v10, %v926_v29  ;;  %v290_v14 = vpop.f32.mrb[9].mxu1 }
 0x100   :  { %v218_v13 = vadd.f32 %v217_v11, %v929_v30  ;;  %v219_v15 = vpop.f32.mrb[10].mxu0  ;;  %v291_v16 = vadd.f32 %v290_v14, %v932_v31  ;;  %v292_v18 = vpop.f32.mrb[10].mxu1 }
 0x101   :  { %v220_v17 = vadd.f32 %v219_v15, %v923_v28  ;;  %v221_v19 = vpop.f32.mrb[11].mxu0  ;;  %v293_v21 = vadd.f32 %v292_v18, %v926_v29  ;;  %v294_v25 = vpop.f32.mrb[11].mxu1 }
 0x102   :  { %v770_v20 = vpack.c.bf16 %v218_v13, %v216_v9  ;;  %v222_v23 = vadd.f32 %v221_v19, %v929_v30  ;;  %v771_v26 = vpack.c.bf16 %v291_v16, %v289_v12  ;;  %v295_v27 = vadd.f32 %v294_v25, %v932_v31 }
 0x104   :  { %661 = vst [vmem:[#allocation5 + $0x80] sm:$0xff] %v770_v20  ;;  %v774_v32 = vpack.c.bf16 %v222_v23, %v220_v17  ;;  %662 = vst [vmem:[#allocation5 + $0x88] sm:$0xff] %v771_v26  ;;  %v775_v33 = vpack.c.bf16 %v295_v27, %v293_v21 }
 0x106   :  { %665 = vst [vmem:[#allocation5 + $0xa0] sm:$0xff] %v774_v32  ;;  %v225_v34 = vpop.f32.mrb[12].mxu0  ;;  %666 = vst [vmem:[#allocation5 + $0xa8] sm:$0xff] %v775_v33  ;;  %v298_v36 = vpop.f32.mrb[12].mxu1 }
 0x107   :  { %v226_v35 = vadd.f32 %v225_v34, %v923_v28  ;;  %v227_v37 = vpop.f32.mrb[13].mxu0  ;;  %v299_v39 = vadd.f32 %v298_v36, %v926_v29  ;;  %v300_v41 = vpop.f32.mrb[13].mxu1 }
 0x108   :  { %v228_v40 = vadd.f32 %v227_v37, %v929_v30  ;;  %v229_v42 = vpop.f32.mrb[14].mxu0  ;;  %v301_v45 = vadd.f32 %v300_v41, %v932_v31  ;;  %v302_v47 = vpop.f32.mrb[14].mxu1 }
 0x109   :  { %v230_v46 = vadd.f32 %v229_v42, %v923_v28  ;;  %v231_v48 = vpop.f32.mrb[15].mxu0  ;;  %v303_v51 = vadd.f32 %v302_v47, %v926_v29  ;;  %v304_v53 = vpop.f32.mrb[15].mxu1  ;;  %v974_v28 = vrot.slane %v917_v24, %v74_v43  ;;  %v980_v29 = vrot.slane %v917_v24, %v78_v49 }
 0x10a   :  { %v778_v50 = vpack.c.bf16 %v228_v40, %v226_v35  ;;  %v232_v52 = vadd.f32 %v231_v48, %v929_v30  ;;  %v779_v54 = vpack.c.bf16 %v301_v45, %v299_v39  ;;  %v305_v55 = vadd.f32 %v304_v53, %v932_v31 }
 0x10c   :  { %669 = vst [vmem:[#allocation5 + $0xc0] sm:$0xff] %v778_v50  ;;  %v782_v57 = vpack.c.bf16 %v232_v52, %v230_v46  ;;  %670 = vst [vmem:[#allocation5 + $0xc8] sm:$0xff] %v779_v54  ;;  %v783_v22 = vpack.c.bf16 %v305_v55, %v303_v51 }
 0x10e   :  { %673 = vst [vmem:[#allocation5 + $0xe0] sm:$0xff] %v782_v57  ;;  %v341_v30 = vpop.f32.mrb[16].mxu0  ;;  %674 = vst [vmem:[#allocation5 + $0xe8] sm:$0xff] %v783_v22  ;;  %v414_v59 = vpop.f32.mrb[16].mxu1 }
 0x10f   :  { %v342_v31 = vadd.f32 %v341_v30, %v971_v56  ;;  %v343_v60 = vpop.f32.mrb[17].mxu0  ;;  %v415_v61 = vadd.f32 %v414_v59, %v974_v28  ;;  %v416_v63 = vpop.f32.mrb[17].mxu1 }
 0x110   :  { %v344_v62 = vadd.f32 %v343_v60, %v977_v58  ;;  %v345_v0 = vpop.f32.mrb[18].mxu0  ;;  %v417_v1 = vadd.f32 %v416_v63, %v980_v29  ;;  %v418_v3 = vpop.f32.mrb[18].mxu1 }
 0x111   :  { %v346_v2 = vadd.f32 %v345_v0, %v971_v56  ;;  %v347_v24 = vpop.f32.mrb[19].mxu0  ;;  %v419_v5 = vadd.f32 %v418_v3, %v974_v28  ;;  %v420_v7 = vpop.f32.mrb[19].mxu1 }
 0x112   :  { %v756_v4 = vpack.c.bf16 %v344_v62, %v342_v31  ;;  %v348_v6 = vadd.f32 %v347_v24, %v977_v58  ;;  %v757_v8 = vpack.c.bf16 %v417_v1, %v415_v61  ;;  %v421_v9 = vadd.f32 %v420_v7, %v980_v29 }
 0x114   :  { %647 = vst [vmem:[#allocation5 + $0x10] sm:$0xff] %v756_v4  ;;  %v760_v10 = vpack.c.bf16 %v348_v6, %v346_v2  ;;  %648 = vst [vmem:[#allocation5 + $0x18] sm:$0xff] %v757_v8  ;;  %v761_v11 = vpack.c.bf16 %v421_v9, %v419_v5 }
 0x116   :  { %651 = vst [vmem:[#allocation5 + $0x30] sm:$0xff] %v760_v10  ;;  %v351_v12 = vpop.f32.mrb[20].mxu0  ;;  %652 = vst [vmem:[#allocation5 + $0x38] sm:$0xff] %v761_v11  ;;  %v424_v14 = vpop.f32.mrb[20].mxu1 }
 0x117   :  { %v352_v13 = vadd.f32 %v351_v12, %v971_v56  ;;  %v353_v15 = vpop.f32.mrb[21].mxu0  ;;  %v425_v16 = vadd.f32 %v424_v14, %v974_v28  ;;  %v426_v18 = vpop.f32.mrb[21].mxu1 }
 0x118   :  { %v354_v17 = vadd.f32 %v353_v15, %v977_v58  ;;  %v355_v19 = vpop.f32.mrb[22].mxu0  ;;  %v427_v20 = vadd.f32 %v426_v18, %v980_v29  ;;  %v428_v23 = vpop.f32.mrb[22].mxu1 }
 0x119   :  { %v356_v21 = vadd.f32 %v355_v19, %v971_v56  ;;  %v357_v25 = vpop.f32.mrb[23].mxu0  ;;  %v429_v27 = vadd.f32 %v428_v23, %v974_v28  ;;  %v430_v33 = vpop.f32.mrb[23].mxu1 }
 0x11a   :  { %v764_v26 = vpack.c.bf16 %v354_v17, %v352_v13  ;;  %v358_v32 = vadd.f32 %v357_v25, %v977_v58  ;;  %v765_v34 = vpack.c.bf16 %v427_v20, %v425_v16  ;;  %v431_v35 = vadd.f32 %v430_v33, %v980_v29 }
 0x11c   :  { %655 = vst [vmem:[#allocation5 + $0x50] sm:$0xff] %v764_v26  ;;  %v768_v36 = vpack.c.bf16 %v358_v32, %v356_v21  ;;  %656 = vst [vmem:[#allocation5 + $0x58] sm:$0xff] %v765_v34  ;;  %v769_v37 = vpack.c.bf16 %v431_v35, %v429_v27 }
 0x11e   :  { %659 = vst [vmem:[#allocation5 + $0x70] sm:$0xff] %v768_v36  ;;  %v361_v38 = vpop.f32.mrb[24].mxu0  ;;  %660 = vst [vmem:[#allocation5 + $0x78] sm:$0xff] %v769_v37  ;;  %v434_v40 = vpop.f32.mrb[24].mxu1 }
 0x11f   :  { %v362_v39 = vadd.f32 %v361_v38, %v971_v56  ;;  %v363_v41 = vpop.f32.mrb[25].mxu0  ;;  %v435_v42 = vadd.f32 %v434_v40, %v974_v28  ;;  %v436_v44 = vpop.f32.mrb[25].mxu1 }
 0x120   :  { %v364_v43 = vadd.f32 %v363_v41, %v977_v58  ;;  %v365_v45 = vpop.f32.mrb[26].mxu0  ;;  %v437_v46 = vadd.f32 %v436_v44, %v980_v29  ;;  %v438_v48 = vpop.f32.mrb[26].mxu1 }
 0x121   :  { %v366_v47 = vadd.f32 %v365_v45, %v971_v56  ;;  %v367_v49 = vpop.f32.mrb[27].mxu0  ;;  %v439_v51 = vadd.f32 %v438_v48, %v974_v28  ;;  %v440_v53 = vpop.f32.mrb[27].mxu1 }
 0x122   :  { %v772_v50 = vpack.c.bf16 %v364_v43, %v362_v39  ;;  %v368_v52 = vadd.f32 %v367_v49, %v977_v58  ;;  %v773_v54 = vpack.c.bf16 %v437_v46, %v435_v42  ;;  %v441_v55 = vadd.f32 %v440_v53, %v980_v29 }
 0x124   :  { %663 = vst [vmem:[#allocation5 + $0x90] sm:$0xff] %v772_v50  ;;  %v776_v57 = vpack.c.bf16 %v368_v52, %v366_v47  ;;  %664 = vst [vmem:[#allocation5 + $0x98] sm:$0xff] %v773_v54  ;;  %v777_v22 = vpack.c.bf16 %v441_v55, %v439_v51 }
 0x126   :  { %667 = vst [vmem:[#allocation5 + $0xb0] sm:$0xff] %v776_v57  ;;  %v371_v30 = vpop.f32.mrb[28].mxu0  ;;  %668 = vst [vmem:[#allocation5 + $0xb8] sm:$0xff] %v777_v22  ;;  %v444_v59 = vpop.f32.mrb[28].mxu1 }
 0x127   :  { %v372_v31 = vadd.f32 %v371_v30, %v971_v56  ;;  %v373_v60 = vpop.f32.mrb[29].mxu0  ;;  %v445_v61 = vadd.f32 %v444_v59, %v974_v28  ;;  %v446_v63 = vpop.f32.mrb[29].mxu1 }
 0x128   :  { %v374_v62 = vadd.f32 %v373_v60, %v977_v58  ;;  %v375_v0 = vpop.f32.mrb[30].mxu0  ;;  %v447_v1 = vadd.f32 %v446_v63, %v980_v29  ;;  %v448_v3 = vpop.f32.mrb[30].mxu1 }
 0x129   :  { %v376_v2 = vadd.f32 %v375_v0, %v971_v56  ;;  %v377_v24 = vpop.f32.mrb[31].mxu0  ;;  %v449_v5 = vadd.f32 %v448_v3, %v974_v28  ;;  %v450_v7 = vpop.f32.mrb[31].mxu1 }
 0x12a   :  { %v780_v4 = vpack.c.bf16 %v374_v62, %v372_v31  ;;  %v378_v6 = vadd.f32 %v377_v24, %v977_v58  ;;  %v781_v8 = vpack.c.bf16 %v447_v1, %v445_v61  ;;  %v451_v9 = vadd.f32 %v450_v7, %v980_v29 }
 0x12c   :  { %671 = vst [vmem:[#allocation5 + $0xd0] sm:$0xff] %v780_v4  ;;  %v784_v10 = vpack.c.bf16 %v378_v6, %v376_v2  ;;  %672 = vst [vmem:[#allocation5 + $0xd8] sm:$0xff] %v781_v8  ;;  %v785_v11 = vpack.c.bf16 %v451_v9, %v449_v5 }
 0x12e   :  { %675 = vst [vmem:[#allocation5 + $0xf0] sm:$0xff] %v784_v10  ;;  %676 = vst [vmem:[#allocation5 + $0xf8] sm:$0xff] %v785_v11 }
 0x12f   :  { %828 = shalt.err (!%p825_p12)
}
 0x130   :  { %s829_s11 = scalar_lea.hbm %s1032_s3, 4096 }
 0x131   :  { %p830_p13 = scmp.ne.s32.totalorder %s1032_s3, %s829_s11  ;;  %p833_p0 = scmp.lt.u32.totalorder %s829_s11, %s1032_s3 }
 0x133   :  { %p835_p1 = pnand %p833_p0, %p830_p13 }
 0x135   :  { %838 = shalt.err (!%p835_p1)
}
 0x136   :  { %688 = dma.vmem_to_hbm [thread:$0]  %s683_s7, 4096, %s1032_s3, [#allocation4], %s844_s22, %s844_s22, %s845_s23  }
 0x137   :  { %841 = dma.done.wait [#allocation4], 4096  }
 0x138   :  { %842 = vsyncadd [#allocation4], 4294963200 }
 0x139   :  { %692 = vsyncpa [#allocation3], 1 }
 0x13a   :  { %693 = vsyncpa [#allocation4], 1 }

</bundles_post_ra>
